<compile_context>
chip_gen: v7x
topology: tpu7x:2x2x1
jax: 0.10.0
libtpu: 0.0.40
codegen_flags: <defaults>
</compile_context>

<pallas_src>
import math

import jax
import jax.numpy as jnp
from jax.experimental import pallas as pl
from jax.experimental.pallas import tpu as pltpu


def _add_kernel(x1_ref, x2_ref, o_ref):
    # Pure VPU elementwise add; dtype promotion happens in-register (free), and
    # size-1 "scalar" operand blocks broadcast against the full tile in-kernel.
    o_ref[...] = (x1_ref[...] + x2_ref[...]).astype(o_ref.dtype)


_LANE_WIDTHS = (16384, 8192, 4096, 2048, 1024, 512, 256, 128)
_TARGET_BLOCK_BYTES = 4 << 20   # ~4 MiB per (widest-dtype) operand block
_VMEM_LIMIT_BYTES = 32 << 20    # 3 arrays x 2 buffers x ~4 MiB = ~24 MiB < 32 MiB


def _num_tensorcores() -> int:
    """Best-effort TensorCores-per-device (for balanced megacore grid splits)."""
    try:
        info = pltpu.get_tpu_info()
        for attr in ("num_cores", "core_count", "num_tensorcores", "tensorcore_count"):
            v = getattr(info, attr, None)
            if isinstance(v, int) and 0 < v <= 8:
                return v
    except Exception:
        pass
    try:
        kind = jax.devices()[0].device_kind.lower()
    except Exception:
        return 1
    # v4/v5p (megacore) and v7x expose 2 TensorCores per device; v5e/v6e have 1.
    return 2 if any(t in kind for t in ("v4", "v5p", "v7", "7x")) else 1


def _vmem_limit_bytes(default: int = _VMEM_LIMIT_BYTES) -> int:
    """Explicit scoped-VMEM budget, leaving headroom vs the chip's physical VMEM."""
    try:
        cap = getattr(pltpu.get_tpu_info(), "vmem_capacity_bytes", None)
        if isinstance(cap, int) and cap > 0:
            return min(default, cap // 2)
    except Exception:
        pass
    return default


def _pick_layout(n: int, sublane: int):
    """Copy-free lane-dense view of a flat length-n array.

    Returns ("2d", rows, cols) for a pure-metadata (rows, cols) reshape, or
    ("1d", n, None) when n is not a multiple of 128 (handled by a masked 1-D
    grid / full-extent block — never a jnp.pad copy).
    """
    if n <= 8 * 128:
        return "2d", 1, n            # single full-extent block; no alignment needed
    if n % 128 == 0:
        for c in _LANE_WIDTHS:       # widest lane-dense cols dividing n exactly
            if n % c == 0 and n // c >= sublane:
                return "2d", n // c, c
        for c in _LANE_WIDTHS:
            if n % c == 0:
                return "2d", n // c, c
    return "1d", n, None


def _pick_tile(count: int, bytes_per_unit: int, granule: int,
               num_tc: int, target_block_bytes: int) -> int:
    """Tile size (in units) along the single grid axis.

    Never smaller than `granule` (dtype-native packed sublane/lane multiple);
    targets ~target_block_bytes per operand block; on multi-TensorCore chips
    produces a balanced, even number of grid steps; on single-TC chips never
    forces an extra grid step.
    """
    if count <= 2 * granule:
        return count                 # single full-extent block is always legal
    tile = max(granule, (target_block_bytes // bytes_per_unit) // granule * granule)
    if num_tc >= 2:
        steps = max(2, pl.cdiv(count, tile))
        if steps % 2:
            steps += 1               # even step count -> balanced megacore split
        tile = max(granule, pl.cdiv(pl.cdiv(count, steps), granule) * granule)
    elif tile >= count:
        tile = count                 # single-TC: one block, no forced split
    return min(tile, count)


def addition_module(x1: jax.Array, x2: jax.Array) -> jax.Array:
    """Equivalent of Addition_Module.forward(x1, x2) = x1 + x2 (with broadcasting)."""
    x1 = jnp.asarray(x1)
    x2 = jnp.asarray(x2)
    out_shape = jnp.broadcast_shapes(x1.shape, x2.shape)
    out_dtype = jnp.result_type(x1.dtype, x2.dtype)

    n = math.prod(out_shape)
    if n == 0:
        return jnp.zeros(out_shape, out_dtype)

    s1 = math.prod(x1.shape)
    s2 = math.prod(x2.shape)
    op1, op2 = x1, x2

    if x1.shape != x2.shape:
        if s2 == 1 and s1 == n:
            pass                     # op2 stays a tiny VMEM block (no HBM expansion)
        elif s1 == 1 and s2 == n:
            pass                     # op1 stays tiny
        else:
            # TODO(synk): express general (non-scalar) broadcasts via BlockSpec
            # index_maps (pin broadcast axes to block 0) instead of materializing.
            op1 = jnp.broadcast_to(x1, out_shape)
            op2 = jnp.broadcast_to(x2, out_shape)
            s1 = s2 = n

    itemsizes = (jnp.dtype(x1.dtype).itemsize,
                 jnp.dtype(x2.dtype).itemsize,
                 jnp.dtype(out_dtype).itemsize)
    max_itemsize = max(itemsizes)
    # Sub-32-bit dtypes pack along sublanes: keep tiles multiples of the packed tile.
    sublane = 8 * (4 // min(itemsizes))

    num_tc = _num_tensorcores()
    vmem_limit = _vmem_limit_bytes()

    kind, rows, cols = _pick_layout(n, sublane)

    if kind == "2d":
        tr = _pick_tile(rows, cols * max_itemsize, sublane, num_tc, _TARGET_BLOCK_BYTES)
        grid = (pl.cdiv(rows, tr),)
        slab_shape = (rows, cols)

        def as_slab(op, size):
            return op.reshape(1, 1) if size == 1 else op.reshape(rows, cols)

        def spec(size):
            if size == 1:
                return pl.BlockSpec((1, 1), lambda i: (0, 0))
            return pl.BlockSpec((tr, cols), lambda i: (i, 0))
    else:
        # n not a multiple of 128: masked 1-D grid, no padding copies.
        granule = sublane * 128
        tr = _pick_tile(n, max_itemsize, granule, num_tc, _TARGET_BLOCK_BYTES)
        grid = (pl.cdiv(n, tr),)
        slab_shape = (n,)

        def as_slab(op, size):
            return op.reshape(1) if size == 1 else op.reshape(n)

        def spec(size):
            if size == 1:
                return pl.BlockSpec((1,), lambda i: (0,))
            return pl.BlockSpec((tr,), lambda i: (i,))

    out_slab = pl.pallas_call(
        _add_kernel,
        out_shape=jax.ShapeDtypeStruct(slab_shape, out_dtype),
        grid_spec=pltpu.PrefetchScalarGridSpec(
            num_scalar_prefetch=0,
            grid=grid,
            in_specs=[spec(s1), spec(s2)],
            out_specs=spec(n),
        ),
        compiler_params=pltpu.CompilerParams(
            dimension_semantics=("parallel",),
            vmem_limit_bytes=vmem_limit,
        ),
        cost_estimate=pl.CostEstimate(
            flops=n,
            transcendentals=0,
            bytes_accessed=s1 * itemsizes[0] + s2 * itemsizes[1] + n * itemsizes[2]),
    )(as_slab(op1, s1), as_slab(op2, s2))

    return out_slab.reshape(out_shape)


if __name__ == "__main__":
    key = jax.random.PRNGKey(0)
    k1, k2, k3, k4 = jax.random.split(key, 4)

    # 1) Common same-shape residual-style add (NCHW activation).
    a = jax.random.normal(k1, (2, 4, 16, 16), dtype=jnp.float32)
    b = jax.random.normal(k2, (2, 4, 16, 16), dtype=jnp.float32)
    out = jax.block_until_ready(addition_module(a, b))
    ref = a + b
    assert out.shape == ref.shape and out.dtype == ref.dtype
    assert jnp.allclose(out, ref, atol=1e-6, rtol=1e-6)

    # 2) Scalar broadcast: the scalar is NOT materialized to full shape in HBM.
    s = jnp.asarray(0.5, dtype=jnp.float32)
    out2 = jax.block_until_ready(addition_module(a, s))
    assert jnp.allclose(out2, a + s, atol=1e-6, rtol=1e-6)

    # 3) Ragged size not divisible by 128 (copy-free full-extent / 1-D path).
    c = jax.random.normal(k3, (3, 5, 7), dtype=jnp.float32)
    d = jax.random.normal(k4, (3, 5, 7), dtype=jnp.float32)
    out3 = jax.block_until_ready(addition_module(c, d))
    assert out3.shape == (3, 5, 7)
    assert jnp.allclose(out3, c + d, atol=1e-6, rtol=1e-6)

    # 4) Mixed dtype: promotion happens inside the kernel.
    a16 = a.astype(jnp.bfloat16)
    out4 = jax.block_until_ready(addition_module(a16, b))
    assert out4.dtype == jnp.result_type(jnp.bfloat16, jnp.float32)
    assert jnp.allclose(out4, a16 + b, atol=1e-2, rtol=1e-2)

    print("KERNEL_OK")
</pallas_src>

<mosaic_0001>
module attributes {stable_mosaic.version = 11 : i64} {
  func.func @_add_kernel(%arg0: i32, %arg1: memref<8x256xf32, #tpu.memory_space<vmem>>, %arg2: memref<8x256xf32, #tpu.memory_space<vmem>>, %arg3: memref<8x256xf32, #tpu.memory_space<vmem>>) attributes {dimension_semantics = [#tpu.dimension_semantics<parallel>], iteration_bounds = array<i64: 1>, scalar_prefetch = 0 : i64, scratch_operands = 0 : i64, tpu.core_type = #tpu.core_type<tc>, window_params = [{transform_indices = @transform_0, window_bounds = array<i64: 8, 256>}, {transform_indices = @transform_1, window_bounds = array<i64: 8, 256>}, {transform_indices = @transform_2, window_bounds = array<i64: 8, 256>}]} {
    %c0 = arith.constant 0 : index
    %c0_0 = arith.constant 0 : index
    %0 = vector.load %arg1[%c0, %c0_0] : memref<8x256xf32, #tpu.memory_space<vmem>>, vector<8x256xf32>
    %c0_1 = arith.constant 0 : index
    %c0_2 = arith.constant 0 : index
    %1 = vector.load %arg2[%c0_1, %c0_2] : memref<8x256xf32, #tpu.memory_space<vmem>>, vector<8x256xf32>
    %2 = arith.addf %0, %1 : vector<8x256xf32>
    %c0_3 = arith.constant 0 : index
    %c0_4 = arith.constant 0 : index
    %3 = vector.load %arg3[%c0_3, %c0_4] : memref<8x256xf32, #tpu.memory_space<vmem>>, vector<8x256xf32>
    tpu.vector_store %arg3[%c0_3, %c0_4], %2 {strides = array<i32>} : memref<8x256xf32, #tpu.memory_space<vmem>>, vector<8x256xf32>,
    return
  }
  func.func @transform_0(%arg0: i32) -> (i32, i32) {
    %c0_i32 = arith.constant 0 : i32
    %c0_i32_0 = arith.constant 0 : i32
    return %arg0, %c0_i32 : i32, i32
  }
  func.func @transform_1(%arg0: i32) -> (i32, i32) {
    %c0_i32 = arith.constant 0 : i32
    %c0_i32_0 = arith.constant 0 : i32
    return %arg0, %c0_i32 : i32, i32
  }
  func.func @transform_2(%arg0: i32) -> (i32, i32) {
    %c0_i32 = arith.constant 0 : i32
    %c0_i32_0 = arith.constant 0 : i32
    return %arg0, %c0_i32 : i32, i32
  }
}

</mosaic_0001>

<bundles_post_ra>
// kernel: tpu_custom_call.1
= control target key start
LH: loop header
LB: loop body
LE: loop exit
PB: predicated region body
PF: predicated region fallthrough
CT: control target
= control target key end

     0   :  { %7 = vsyncpa [#allocation3], 0  ;;  %s189_s0 = inlined_call_operand.hbm [shape: f32[8,256], index: 0, kind: input, shape index: {}]   ;;  %s190_s1 = inlined_call_operand.hbm [shape: f32[8,256], index: 1, kind: input, shape index: {}]   ;;  %s191_s2 = inlined_call_operand.hbm [shape: f32[8,256], index: 2, kind: output, shape index: {}]  }
   0x1   :  { %8 = vsyncpa [#allocation6], 0 }
   0x2   :  { %9 = vsyncpa [#allocation4], 0  ;;  %s135_s9 = smov [#allocation2]   ;;  %s136_s11 = smov [#allocation5]  }
   0x3   :  { %s16_s10 = sshll.u32 %s135_s9, 4  ;;  %s26_s12 = sshll.u32 %s136_s11, 4  ;;  %s17_s10 = int_to_ptr.vmem [resolvable:$true] %s16_s10  ;;  %s27_s12 = int_to_ptr.vmem [resolvable:$true] %s26_s12 }
   0x4   :  { %s63_s15 = scalar_lea.hbm %s189_s0, 256 }
   0x5   :  { %p64_p0 = scmp.ne.s32.totalorder %s189_s0, %s63_s15  ;;  %p67_p1 = scmp.lt.u32.totalorder %s63_s15, %s189_s0 }
   0x7   :  { %p69_p2 = pnand %p67_p1, %p64_p0 }
   0x9   :  { %72 = shalt.err (!%p69_p2)
}
   0xa   :  { %s73_s20 = scalar_lea.vmem %s17_s10, 256  ;;  %p78_p4 = scmp.lt.s32.totalorder %s17_s10, %s17_s10 }
   0xb   :  { %p74_p3 = scmp.ne.s32.totalorder %s17_s10, %s73_s20  ;;  %p79_p5 = scmp.lt.s32.totalorder %s73_s20, %s73_s20 }
   0xd   :  { %p80_p6 = por %p79_p5, %p78_p4 }
   0xf   :  { %p81_p7 = pnand %p80_p6, %p74_p3 }
  0x11   :  { %84 = shalt.err (!%p81_p7)
}
  0x12   :  { %19 = dma.hbm_to_vmem [thread:$0]  %s189_s0, 256, %s17_s10, [#allocation3]  }
  0x13   :  { %s85_s25 = scalar_lea.hbm %s190_s1, 256 }
  0x14   :  { %p86_p8 = scmp.ne.s32.totalorder %s190_s1, %s85_s25  ;;  %p89_p9 = scmp.lt.u32.totalorder %s85_s25, %s190_s1 }
  0x16   :  { %p91_p10 = pnand %p89_p9, %p86_p8 }
  0x18   :  { %94 = shalt.err (!%p91_p10)
}
  0x19   :  { %s95_s30 = scalar_lea.vmem %s27_s12, 256  ;;  %p100_p12 = scmp.lt.s32.totalorder %s27_s12, %s27_s12 }
  0x1a   :  { %p96_p11 = scmp.ne.s32.totalorder %s27_s12, %s95_s30  ;;  %p101_p13 = scmp.lt.s32.totalorder %s95_s30, %s95_s30 }
  0x1c   :  { %p102_p0 = por %p101_p13, %p100_p12 }
  0x1e   :  { %p103_p1 = pnand %p102_p0, %p96_p11 }
  0x20   :  { %106 = shalt.err (!%p103_p1)
}
  0x21   :  { %29 = dma.hbm_to_vmem [thread:$0]  %s190_s1, 256, %s27_s12, [#allocation6]  }
  0x22   :  { %129 = dma.done.wait [#allocation3], 256  }
  0x23   :  { %130 = vsyncadd [#allocation3], 4294967040 }
  0x24   :  { %131 = dma.done.wait [#allocation6], 256  }
  0x25   :  { %132 = vsyncadd [#allocation6], 4294967040  ;;  %s137_s4 = smov [#allocation7]   ;;  %v36_v0 = vld [vmem:[#allocation2] sm:$0xff]  ;;  %v38_v1 = vld [vmem:[#allocation5] sm:$0xff] }
  0x26   :  { %s50_s5 = sshll.u32 %s137_s4, 4  ;;  %v37_v2 = vld [vmem:[#allocation2 + $0x8] sm:$0xff]  ;;  %v40_v3 = vadd.f32 %v38_v1, %v36_v0  ;;  %v39_v4 = vld [vmem:[#allocation5 + $0x8] sm:$0xff]  ;;  %s51_s5 = int_to_ptr.vmem [resolvable:$true] %s50_s5 }
  0x27   :  { %v41_v5 = vadd.f32 %v39_v4, %v37_v2  ;;  %s107_s6 = scalar_lea.vmem %s51_s5, 256  ;;  %p112_p3 = scmp.lt.s32.totalorder %s51_s5, %s51_s5 }
  0x28   :  { %42 = vst [vmem:[#allocation7] sm:$0xff] %v40_v3  ;;  %p108_p2 = scmp.ne.s32.totalorder %s51_s5, %s107_s6  ;;  %p113_p4 = scmp.lt.s32.totalorder %s107_s6, %s107_s6 }
  0x29   :  { %43 = vst [vmem:[#allocation7 + $0x8] sm:$0xff] %v41_v5 }
  0x2a   :  { %p114_p5 = por %p113_p4, %p112_p3 }
  0x2c   :  { %p115_p6 = pnand %p114_p5, %p108_p2 }
  0x2e   :  { %118 = shalt.err (!%p115_p6)
}
  0x2f   :  { %s119_s8 = scalar_lea.hbm %s191_s2, 256 }
  0x30   :  { %p120_p7 = scmp.ne.s32.totalorder %s191_s2, %s119_s8  ;;  %p123_p8 = scmp.lt.u32.totalorder %s119_s8, %s191_s2 }
  0x32   :  { %p125_p9 = pnand %p123_p8, %p120_p7 }
  0x34   :  { %128 = shalt.err (!%p125_p9)
}
  0x35   :  { %53 = dma.vmem_to_hbm [thread:$0]  %s51_s5, 256, %s191_s2, [#allocation4]  }
  0x36   :  { %133 = dma.done.wait [#allocation4], 256  }
  0x37   :  { %134 = vsyncadd [#allocation4], 4294967040 }
  0x38   :  { %57 = vsyncpa [#allocation3], 1 }
  0x39   :  { %58 = vsyncpa [#allocation6], 1 }
  0x3a   :  { %59 = vsyncpa [#allocation4], 1 }

</bundles_post_ra>
